<compile_context>
chip_gen: v6e
topology: v6e:2x2x1
jax: 0.10.0
libtpu: 0.0.40
codegen_flags: <defaults>
</compile_context>

<pallas_src>
import jax
import jax.numpy as jnp
from jax import lax
from jax.experimental import pallas as pl
from jax.experimental.pallas import tpu as pltpu

BASELINE = 10.0  # EmbBGConv_unit.baseline = 10 * torch.ones(1)


def _round_up(x, m):
    return ((x + m - 1) // m) * m


def _choose_row_tile(n):
    """Row tile: multiple of 8, >=2 tiles when possible (megacore), cap 256
    so double-buffered bf16 tiles stay well inside v7x's 64 MiB VMEM."""
    if n <= 16:
        return _round_up(n, 8)
    if n <= 512:
        return _round_up((n + 1) // 2, 8)
    return 256


# -----------------------------------------------------------------------------
# Kernel 1: fused Linear + LeakyReLU(0.01) + eval-mode BatchNorm1d embedding.
# -----------------------------------------------------------------------------
def emb_kernel(x_ref, w_ref, b_ref, scale_ref, shift_ref, o_ref):
    z = jnp.dot(x_ref[...], w_ref[...], preferred_element_type=jnp.float32)
    z = z + b_ref[...]                      # Linear bias
    z = jnp.where(z >= 0, z, 0.01 * z)      # LeakyReLU(0.01)
    o_ref[...] = (z * scale_ref[...] + shift_ref[...]).astype(o_ref.dtype)


def emb_forward(x, w, b, bn_scale, bn_shift):
    """x: (N, K) f32 -> (N_pad, H) f32 (rows zero-padded to the row tile)."""
    n, k = x.shape
    h = w.shape[1]
    tn = _choose_row_tile(n)
    n_pad = _round_up(n, tn)
    if n_pad != n:
        x = jnp.pad(x, ((0, n_pad - n), (0, 0)))

    # bf16 feeds the MXU at ~2x f32-equivalent throughput and halves the HBM
    # traffic for x and W; the epilogue stays f32 (v5e has no bf16 VPU path).
    xb = x.astype(jnp.bfloat16)
    wb = w.astype(jnp.bfloat16)

    return pl.pallas_call(
        emb_kernel,
        out_shape=jax.ShapeDtypeStruct((n_pad, h), jnp.float32),
        grid_spec=pltpu.PrefetchScalarGridSpec(
            num_scalar_prefetch=0,
            grid=(n_pad // tn,),
            in_specs=[
                pl.BlockSpec((tn, k), lambda i: (i, 0)),   # x row tile (pipelined)
                pl.BlockSpec((k, h), lambda i: (0, 0)),    # W (resident)
                pl.BlockSpec((1, h), lambda i: (0, 0)),    # bias
                pl.BlockSpec((1, h), lambda i: (0, 0)),    # BN scale
                pl.BlockSpec((1, h), lambda i: (0, 0)),    # BN shift
            ],
            out_specs=pl.BlockSpec((tn, h), lambda i: (i, 0)),
        ),
        compiler_params=pltpu.CompilerParams(
            dimension_semantics=("parallel",),          # shard row tiles over TCs
            vmem_limit_bytes=48 * 1024 * 1024,          # headroom under v7x 64 MiB
        ),
    )(xb, wb, b, bn_scale, bn_shift)


# -----------------------------------------------------------------------------
# Kernel 2: per-relation subject*object embedding product with the row gather
# fused into the kernel (pair indices scalar-prefetched into SMEM).
# -----------------------------------------------------------------------------
def pair_prod_kernel(sub_ref, obj_ref, emb_ref, out_ref):
    t = pl.program_id(0)
    tr = out_ref.shape[0]
    base = t * tr
    # Short static loop: dynamic row loads from the resident emb block, static
    # lane-dense row stores into the (tr, H) output tile.
    for j in range(tr):
        s = sub_ref[base + j]
        o = obj_ref[base + j]
        out_ref[pl.ds(j, 1), :] = (emb_ref[pl.ds(s, 1), :] *
                                   emb_ref[pl.ds(o, 1), :])


def pair_prod_forward(emb, pairs):
    """emb: (N_pad, H) f32, pairs: (R, 2) int -> (R, H) f32."""
    n_rows, h = emb.shape
    r = pairs.shape[0]
    tr = 8 if r <= 64 else 32
    r_pad = _round_up(r, tr)
    sub = jnp.pad(pairs[:, 0].astype(jnp.int32), (0, r_pad - r))
    obj = jnp.pad(pairs[:, 1].astype(jnp.int32), (0, r_pad - r))

    out = pl.pallas_call(
        pair_prod_kernel,
        out_shape=jax.ShapeDtypeStruct((r_pad, h), jnp.float32),
        grid_spec=pltpu.PrefetchScalarGridSpec(
            num_scalar_prefetch=2,                          # sub, obj -> SMEM
            grid=(r_pad // tr,),
            in_specs=[pl.BlockSpec((n_rows, h),
                                   lambda t, s_ref, o_ref: (0, 0))],  # resident
            out_specs=pl.BlockSpec((tr, h),
                                   lambda t, s_ref, o_ref: (t, 0)),
        ),
        compiler_params=pltpu.CompilerParams(
            dimension_semantics=("parallel",)),
    )(sub, obj, emb)
    return out[:r]


# -----------------------------------------------------------------------------
# Per-object softmax-weighted aggregation (the feat_dict / conf_dict loops),
# rewritten as numerically-stable scatter ops.
# TODO(synk): data-dependent scatter with duplicate indices stays in plain JAX;
#             no clean single-pass Pallas TPU equivalent.
# -----------------------------------------------------------------------------
def softmax_aggregate(obj_feats, prod, pairs, confidence, baseline=BASELINE):
    n = obj_feats.shape[0]
    sub = pairs[:, 0]
    obj = pairs[:, 1]
    conf = confidence.reshape(-1).astype(jnp.float32)

    m = jnp.full((n,), baseline, jnp.float32)
    m = m.at[sub].max(conf)
    m = m.at[obj].max(conf)

    e_sub = jnp.exp(conf - m[sub])
    e_obj = jnp.exp(conf - m[obj])
    e_base = jnp.exp(baseline - m)

    denom = e_base.at[sub].add(e_sub).at[obj].add(e_obj)
    numer = e_base[:, None] * obj_feats
    numer = numer.at[sub].add(e_sub[:, None] * prod)
    numer = numer.at[obj].add(e_obj[:, None] * prod)
    return numer / denom[:, None]


# -----------------------------------------------------------------------------
# EmbBGConv_unit.forward / EmbBGGCN.forward
# -----------------------------------------------------------------------------
def emb_bg_conv_unit_forward(obj_feats, pairs, confidence, params):
    w, b, bn_scale, bn_shift = params
    emb = emb_forward(obj_feats, w, b, bn_scale, bn_shift)   # (O_pad, H)
    prod = pair_prod_forward(emb, pairs)                     # (R, H)
    return softmax_aggregate(obj_feats, prod, pairs, confidence)


def emb_bg_gcn_forward(obj_feats, pairs, confidence, params, gconv_layers=1):
    # gconv_layers == 0 -> Identity (loop is a no-op), matching EmbBGGCN.
    for _ in range(gconv_layers):
        obj_feats = emb_bg_conv_unit_forward(obj_feats, pairs, confidence,
                                             params)
    return obj_feats


# -----------------------------------------------------------------------------
# Parameters: Linear(feat_dim, hidden_dim) with kaiming_normal_ weights
# (_init_weight), default uniform bias, default eval-mode BatchNorm buffers.
# Weight stored as (in, out) = W^T vs PyTorch's (out, in).
# -----------------------------------------------------------------------------
def init_params(key, feat_dim, hidden_dim, eps=1e-5):
    kw, kb = jax.random.split(key)
    w = jax.random.normal(kw, (feat_dim, hidden_dim), jnp.float32) * jnp.sqrt(
        2.0 / feat_dim)
    bound = 1.0 / jnp.sqrt(float(feat_dim))
    b = jax.random.uniform(kb, (1, hidden_dim), jnp.float32, -bound, bound)
    bn_scale = jnp.full((1, hidden_dim), 1.0 / jnp.sqrt(1.0 + eps), jnp.float32)
    bn_shift = jnp.zeros((1, hidden_dim), jnp.float32)
    return (w, b, bn_scale, bn_shift)


# -----------------------------------------------------------------------------
# Pure-JAX reference: literal (Python-loop) transcription of the PyTorch code.
# Uses the same bf16 cast for the Linear as the kernel (deliberate perf choice).
# -----------------------------------------------------------------------------
def ref_forward(obj_feats, pairs, confidence, params, baseline=BASELINE):
    w, b, bn_scale, bn_shift = params
    max_idx = int(pairs.max())
    x = obj_feats[: max_idx + 1].astype(jnp.bfloat16)
    z = jnp.dot(x, w.astype(jnp.bfloat16),
                preferred_element_type=jnp.float32) + b
    z = jnp.where(z >= 0, z, 0.01 * z)
    emb = z * bn_scale + bn_shift
    gathered = emb[pairs]                                   # (R, 2, H)

    feat_lists = {i: [obj_feats[i]] for i in range(max_idx + 1)}
    conf_lists = {i: [jnp.array([baseline], jnp.float32)]
                  for i in range(max_idx + 1)}
    new_feats = [obj_feats[i] for i in range(obj_feats.shape[0])]
    for r in range(pairs.shape[0]):
        s, o = int(pairs[r, 0]), int(pairs[r, 1])
        nf = gathered[r, 0] * gathered[r, 1]
        feat_lists[s].append(nf)
        conf_lists[s].append(confidence[r].reshape(-1))
        feat_lists[o].append(nf)
        conf_lists[o].append(confidence[r].reshape(-1))
    for i in range(max_idx + 1):
        weights = jax.nn.softmax(jnp.concatenate(conf_lists[i]))
        new_feats[i] = weights @ jnp.stack(feat_lists[i])
    return jnp.stack(new_feats)


if __name__ == "__main__":
    # Small shapes consistent with the module (defaults feat_dim=hidden_dim=2048).
    O, R = 24, 40
    FEAT_DIM = HIDDEN_DIM = 256   # aggregation requires feat_dim == hidden_dim

    key = jax.random.PRNGKey(0)
    k0, k1, k2, k3 = jax.random.split(key, 4)
    obj_feats = jax.random.normal(k0, (O, FEAT_DIM), jnp.float32)
    pairs = jax.random.randint(k1, (R, 2), 0, O, dtype=jnp.int32)
    # Confidences near the baseline (=10) so the pair products actually matter.
    confidence = jax.random.uniform(k2, (R,), jnp.float32, 8.0, 12.0)
    params = init_params(k3, FEAT_DIM, HIDDEN_DIM)

    out = emb_bg_gcn_forward(obj_feats, pairs, confidence, params,
                             gconv_layers=1)
    out = jax.block_until_ready(out)

    ref = ref_forward(obj_feats, pairs, confidence, params)
    assert out.shape == (O, FEAT_DIM), out.shape
    err = float(jnp.max(jnp.abs(out - ref)))
    assert err < 5e-3, f"max err {err}"
    print("KERNEL_OK")
</pallas_src>

<mosaic_0001>
module attributes {stable_mosaic.version = 11 : i64} {
  func.func @emb_kernel(%arg0: i32, %arg1: memref<16x256xbf16, #tpu.memory_space<vmem>>, %arg2: memref<256x256xbf16, #tpu.memory_space<vmem>>, %arg3: memref<1x256xf32, #tpu.memory_space<vmem>>, %arg4: memref<1x256xf32, #tpu.memory_space<vmem>>, %arg5: memref<1x256xf32, #tpu.memory_space<vmem>>, %arg6: memref<16x256xf32, #tpu.memory_space<vmem>>) attributes {dimension_semantics = [#tpu.dimension_semantics<parallel>], iteration_bounds = array<i64: 2>, scalar_prefetch = 0 : i64, scratch_operands = 0 : i64, tpu.core_type = #tpu.core_type<tc>, window_params = [{transform_indices = @transform_0, window_bounds = array<i64: 16, 256>}, {pipeline_mode = #tpu.pipeline_mode<synchronous>, transform_indices = @transform_1, window_bounds = array<i64: 256, 256>}, {pipeline_mode = #tpu.pipeline_mode<synchronous>, transform_indices = @transform_2, window_bounds = array<i64: 1, 256>}, {pipeline_mode = #tpu.pipeline_mode<synchronous>, transform_indices = @transform_3, window_bounds = array<i64: 1, 256>}, {pipeline_mode = #tpu.pipeline_mode<synchronous>, transform_indices = @transform_4, window_bounds = array<i64: 1, 256>}, {transform_indices = @transform_5, window_bounds = array<i64: 16, 256>}]} {
    %c0 = arith.constant 0 : index
    %c0_0 = arith.constant 0 : index
    %0 = vector.load %arg1[%c0, %c0_0] : memref<16x256xbf16, #tpu.memory_space<vmem>>, vector<16x256xbf16>
    %c0_1 = arith.constant 0 : index
    %c0_2 = arith.constant 0 : index
    %1 = vector.load %arg2[%c0_1, %c0_2] : memref<256x256xbf16, #tpu.memory_space<vmem>>, vector<256x256xbf16>
    %cst = arith.constant dense<0.000000e+00> : vector<16x256xf32>
    %2 = tpu.matmul %0, %1, %cst {dimension_numbers = #tpu.dot_dimension_numbers<[1], [0], [0], [1], [0, 0, 1, 1], [], []>} : vector<16x256xbf16>, vector<256x256xbf16>, vector<16x256xf32> -> vector<16x256xf32>
    %c0_3 = arith.constant 0 : index
    %c0_4 = arith.constant 0 : index
    %3 = vector.load %arg3[%c0_3, %c0_4] : memref<1x256xf32, #tpu.memory_space<vmem>>, vector<1x256xf32>
    %4 = vector.broadcast %3 : vector<1x256xf32> to vector<16x256xf32>
    %5 = arith.addf %2, %4 : vector<16x256xf32>
    %cst_5 = arith.constant 0.000000e+00 : f32
    %6 = vector.broadcast %cst_5 : f32 to vector<16x256xf32>
    %7 = arith.cmpf oge, %5, %6 : vector<16x256xf32>
    %cst_6 = arith.constant 0.00999999977 : f32
    %8 = vector.broadcast %cst_6 : f32 to vector<16x256xf32>
    %9 = arith.mulf %8, %5 : vector<16x256xf32>
    %10 = arith.select %7, %5, %9 : vector<16x256xi1>, vector<16x256xf32>
    %c0_7 = arith.constant 0 : index
    %c0_8 = arith.constant 0 : index
    %11 = vector.load %arg4[%c0_7, %c0_8] : memref<1x256xf32, #tpu.memory_space<vmem>>, vector<1x256xf32>
    %12 = vector.broadcast %11 : vector<1x256xf32> to vector<16x256xf32>
    %13 = arith.mulf %10, %12 : vector<16x256xf32>
    %c0_9 = arith.constant 0 : index
    %c0_10 = arith.constant 0 : index
    %14 = vector.load %arg5[%c0_9, %c0_10] : memref<1x256xf32, #tpu.memory_space<vmem>>, vector<1x256xf32>
    %15 = vector.broadcast %14 : vector<1x256xf32> to vector<16x256xf32>
    %16 = arith.addf %13, %15 : vector<16x256xf32>
    %c0_11 = arith.constant 0 : index
    %c0_12 = arith.constant 0 : index
    %17 = vector.load %arg6[%c0_11, %c0_12] : memref<16x256xf32, #tpu.memory_space<vmem>>, vector<16x256xf32>
    tpu.vector_store %arg6[%c0_11, %c0_12], %16 {strides = array<i32>} : memref<16x256xf32, #tpu.memory_space<vmem>>, vector<16x256xf32>,
    return
  }
  func.func @transform_0(%arg0: i32) -> (i32, i32) {
    %c0_i32 = arith.constant 0 : i32
    %c0_i32_0 = arith.constant 0 : i32
    return %arg0, %c0_i32 : i32, i32
  }
  func.func @transform_1(%arg0: i32) -> (i32, i32) {
    %c0_i32 = arith.constant 0 : i32
    %c0_i32_0 = arith.constant 0 : i32
    %c0_i32_1 = arith.constant 0 : i32
    return %c0_i32, %c0_i32_0 : i32, i32
  }
  func.func @transform_2(%arg0: i32) -> (i32, i32) {
    %c0_i32 = arith.constant 0 : i32
    %c0_i32_0 = arith.constant 0 : i32
    %c0_i32_1 = arith.constant 0 : i32
    return %c0_i32, %c0_i32_0 : i32, i32
  }
  func.func @transform_3(%arg0: i32) -> (i32, i32) {
    %c0_i32 = arith.constant 0 : i32
    %c0_i32_0 = arith.constant 0 : i32
    %c0_i32_1 = arith.constant 0 : i32
    return %c0_i32, %c0_i32_0 : i32, i32
  }
  func.func @transform_4(%arg0: i32) -> (i32, i32) {
    %c0_i32 = arith.constant 0 : i32
    %c0_i32_0 = arith.constant 0 : i32
    %c0_i32_1 = arith.constant 0 : i32
    return %c0_i32, %c0_i32_0 : i32, i32
  }
  func.func @transform_5(%arg0: i32) -> (i32, i32) {
    %c0_i32 = arith.constant 0 : i32
    %c0_i32_0 = arith.constant 0 : i32
    return %arg0, %c0_i32 : i32, i32
  }
}

</mosaic_0001>

<bundles_post_ra>
// kernel: tpu_custom_call.1
= control target key start
LH: loop header
LB: loop body
LE: loop exit
PB: predicated region body
PF: predicated region fallthrough
CT: control target
= control target key end

     0   :  { %10 = vsyncpa [#allocation3], 0  ;;  %s1192_s0 = inlined_call_operand.hbm [shape: bf16[32,256], index: 0, kind: input, shape index: {}]   ;;  %s1193_s1 = inlined_call_operand.hbm [shape: bf16[256,256], index: 1, kind: input, shape index: {}]   ;;  %s1194_s2 = inlined_call_operand.vmem [shape: f32[1,256], index: 2, kind: input, shape index: {}]   ;;  %s1195_s3 = inlined_call_operand.vmem [shape: f32[1,256], index: 3, kind: input, shape index: {}]   ;;  %s1196_s4 = inlined_call_operand.vmem [shape: f32[1,256], index: 4, kind: input, shape index: {}]   ;;  %s1197_s5 = inlined_call_operand.hbm [shape: f32[32,256], index: 5, kind: output, shape index: {}]  }
   0x1   :  { %12 = vsyncpa [#allocation3 + $0x1], 0 }
   0x2   :  { %13 = vsyncpa [#allocation6], 0 }
   0x3   :  { %14 = vsyncpa [#allocation4], 0 }
   0x4   :  { %16 = vsyncpa [#allocation4 + $0x1], 0  ;;  %s995_s18 = smov 0   ;;  %s997_s19 = smov 0  }
   0x5   :  { %s999_s20 = smov 0   ;;  %s1001_s21 = smov 0  }
   0x6 LB: > { %s1016_s22 = sadd.s32 4294967295, %s956_s21   ;;  %s666_s23 = sadd.s32 4294967294, %s956_s21   ;;  %s956_s21 = sphi %s1001_s21, %s1221_s21   ;;  %s952_s20 = sphi %s999_s20, %s1220_s20   ;;  %s948_s19 = sphi %s997_s19, %s1219_s19   ;;  %s944_s18 = sphi %s995_s18, %s1218_s18  }
   0x7   : > { %p42_p0 = scmp.ne.s32.totalorder %s948_s19, %s944_s18  ;;  %p1198_p1 = scmp.eq.s32.totalorder %s1016_s22, 0 }
   0x8   : > { %p156_p3 = scmp.eq.s32.totalorder %s666_s23, 1  ;;  %p667_p5 = scmp.ge.s32.totalorder %s956_s21, 1 }
   0x9   : > { %p1025_p4 = por %p1198_p1, %p42_p0  ;;  %p163_p7 = scmp.lt.s32.totalorder %s956_s21, 3 }
   0xa   : > { %p1030_p6 = por %p156_p3, %p42_p0  ;;  %s958_s27 = smov [#allocation5]  }
   0xb   : > { %s1203_s24 = scalar_select %p1025_p4, 1, 0 }
   0xc   : > { %s1204_s25 = scalar_select %p1030_p6, 1, 0 }
   0xd   : > { %p1035_p8 = pnand %p667_p5, %p163_p7  ;;  %s175_s28 = sshll.u32 %s958_s27, 4  ;;  %s176_s28 = int_to_ptr.vmem [resolvable:$true] %s175_s28 }
   0xe   : > { %s1049_s30 = sadd.s32 1, %s956_s21   ;;  %s29_s6 = sadd.s32 1, %s952_s20 }
   0xf   : > { %s1205_s26 = scalar_select %p1035_p8, 1, 0 }
  0x10   : > { %p730_p9 = pneg %p1035_p8  ;;  %s26_s7 = ssub.s32 %s956_s21, %s1049_s30 }
  0x11   : > { %s845_s8 = scalar_lea.vmem %s176_s28, 4096  ;;  %p853_p5 = scmp.lt.s32.totalorder %s176_s28, %s176_s28 }
  0x12   : > { %p1044_p11 = pnand %p730_p9, %p1198_p1  ;;  %p846_p13 = scmp.ne.s32.totalorder %s176_s28, %s845_s8 }
  0x13   : > { %p854_p7 = scmp.lt.s32.totalorder %s845_s8, %s845_s8 }
  0x14   : > { %p836_p12 = pneg %p1044_p11 }
  0x15   : > { %p855_p10 = por %p854_p7, %p853_p5 }
  0x16   : > { %p848_p0 = pnand %p846_p13, %p836_p12 }
  0x18   : > { %p849_p3 = pneg %p848_p0 }
  0x1a   : > { %p856_p2 = pnand %p855_p10, %p849_p3 }
  0x1c   : > { %859 = shalt.err (!%p856_p2)
}
  0x1d   : > { %s1199_s9 = smov 128   ;;  %s960_s10 = smov 8  }
  0x1e   : > { %733 = dma.hbm_to_vmem [thread:$0]  (!%p1044_p11), %s1193_s1, 4096, %s176_s28, [#allocation6], %s1199_s9, %s1199_s9, %s960_s10  }
  0x1f   : > { %p27_p2 = scmp.eq.s32.totalorder %s26_s7, 0  ;;  %p36_p9 = scmp.ne.s32.totalorder %s952_s20, %s948_s19 }
  0x20   : > { %p37_p10 = scmp.eq.s32.totalorder %s956_s21, 0  ;;  %p743_p12 = scmp.lt.s32.totalorder %s956_s21, 2 }
  0x21   : > { %s1069_s13 = scalar_select %p27_p2, %s952_s20, %s29_s6  }
  0x22   : > { %p38_p13 = por %p37_p10, %p36_p9  ;;  %p1207_p0 = scmp.eq.s32.totalorder %s1016_s22, 1 }
  0x23   : > { %s198_s15 = sand.u32 1, %s952_s20   ;;  %s719_s16 = sshll.u32 %s956_s21, 8 }
  0x24   : > { %p1073_p3 = por %p1207_p0, %p36_p9  ;;  %s670_s17 = sshll.u32 %s198_s15, 4 }
  0x25   : > { %s1082_s29 = scalar_lea.hbm %s1192_s0, %s719_s16  ;;  %s202_s28 = scalar_lea.vmem [#allocation2], %s670_s17 }
  0x26   : > { %s1208_s14 = scalar_select %p1073_p3, 1, 0 }
  0x27   : > { %s210_s6 = sshll.u32 %s202_s28, 4  ;;  %p1084_p11 = pnand %p743_p12, %p38_p13  ;;  %s1088_s6 = int_to_ptr.vmem [resolvable:$true] %s210_s6 }
  0x28   : > { %s1090_s8 = scalar_lea.sflag [#allocation3], %s198_s15  ;;  %s860_s11 = scalar_lea.hbm %s1082_s29, 256 }
  0x29   : > { %p861_p5 = scmp.ne.s32.totalorder %s1082_s29, %s860_s11  ;;  %p862_p7 = pneg %p1084_p11 }
  0x2a   : > { %s865_s17 = scalar_lea.hbm %s1192_s0, 512  ;;  %p866_p10 = scmp.lt.s32.totalorder %s1082_s29, %s1192_s0 }
  0x2b   : > { %p863_p2 = pnand %p862_p7, %p861_p5  ;;  %p867_p12 = scmp.lt.s32.totalorder %s865_s17, %s860_s11 }
  0x2d   : > { %p864_p9 = pneg %p863_p2  ;;  %p868_p13 = por %p867_p12, %p866_p10 }
  0x2f   : > { %p869_p0 = pnand %p868_p13, %p864_p9 }
  0x31   : > { %872 = shalt.err (!%p869_p0)
}
  0x32   : > { %s873_s15 = scalar_lea.vmem %s1088_s6, 256  ;;  %s961_s28 = smov [#allocation2]  }
  0x33   : > { %p874_p1 = scmp.ne.s32.totalorder %s1088_s6, %s873_s15  ;;  %s878_s9 = sshll.u32 %s961_s28, 4  ;;  %s879_s9 = int_to_ptr.vmem [resolvable:$false] %s878_s9 }
  0x34   : > { %s880_s12 = scalar_lea.vmem %s879_s9, 512  ;;  %p881_p2 = scmp.lt.s32.totalorder %s1088_s6, %s879_s9 }
  0x35   : > { %p876_p6 = pnand %p874_p1, %p862_p7  ;;  %p882_p3 = scmp.lt.s32.totalorder %s880_s12, %s873_s15 }
  0x37   : > { %p877_p5 = pneg %p876_p6  ;;  %p883_p4 = por %p882_p3, %p881_p2 }
  0x39   : > { %p884_p8 = pnand %p883_p4, %p877_p5 }
  0x3b   : > { %887 = shalt.err (!%p884_p8)
}
  0x3c   : > { %s1210_s11 = smov 128   ;;  %p1211_p1 = scmp.ne.s32.totalorder %s1205_s26, 0 }
  0x3d   : > { %737 = dma.hbm_to_vmem [thread:$0]  (!%p1084_p11), %s1082_s29, 256, %s1088_s6, %s1090_s8, %s1210_s11, %s1210_s11, %s960_s10  }
  0x3e   : > { %222 = sbr.rel (%p1211_p1) target bundleno = 358 (0x166), region = 40  ;;  %s1117_s16 = sand.u32 (!%p1211_p1), 1, %s948_s19  }
  0x3f   : > { %s675_s9 = sshll.u32 (!%p1211_p1), %s1117_s16, 4  ;;  %s225_s17 = scalar_lea.sflag (!%p1211_p1), [#allocation3], %s1117_s16 }
  0x40   : > { %s1121_s23 = scalar_lea.vmem (!%p1211_p1), [#allocation2], %s675_s9  ;;  %p1212_p4 = scmp.ne.s32.totalorder (!%p1211_p1), %s1203_s24, 0 }
  0x43   : > { %931 = dma.done.wait (%p1212_p4), %s225_s17, 256  }
  0x44   : > { %933 = vsyncadd (%p1212_p4), %s225_s17, 4294967040  ;;  %p1213_p6 = scmp.eq.s32.totalorder %s1016_s22, 0 }
  0x46   : > { %935 = dma.done.wait (%p1213_p6), [#allocation6], 4096   ;;  %p1214_p8 = pmov %p1213_p6 }
  0x47   : > { %v783_v0 = vld [vmem:[#allocation5 + $0x74] ss:$8 sps:$4 sm:$0xff]   ;;  %v785_v1 = vld [vmem:[#allocation5 + $0x70] ss:$8 sps:$4 sm:$0xff]   ;;  %v786_v2 = vld [vmem:[#allocation5 + $0x64] ss:$8 sps:$4 sm:$0xff]   ;;  %v297_v34 = vlaneseq }
  0x48   : > { %937 = vsyncadd (%p1214_p8), [#allocation6], 4294963200  ;;  %477 = vmatprep.subr.bf16.mxu0 %v783_v0  ;;  %v788_v3 = vld [vmem:[#allocation5 + $0x60] ss:$8 sps:$4 sm:$0xff]   ;;  %v789_v4 = vld [vmem:[#allocation5 + $0x54] ss:$8 sps:$4 sm:$0xff]  }
  0x49   : > { %478 = vmatpush1.bf16.msra.mxu0 %v785_v1  ;;  %v791_v5 = vld [vmem:[#allocation5 + $0x50] ss:$8 sps:$4 sm:$0xff]   ;;  %v792_v6 = vld [vmem:[#allocation5 + $0x44] ss:$8 sps:$4 sm:$0xff]   ;;  %v794_v7 = vld [vmem:[#allocation5 + $0x40] ss:$8 sps:$4 sm:$0xff]  }
  0x4a   : > { %479 = vmatprep.subr.bf16.mxu0 %v786_v2  ;;  %v795_v8 = vld [vmem:[#allocation5 + $0x34] ss:$8 sps:$4 sm:$0xff]   ;;  %v797_v9 = vld [vmem:[#allocation5 + $0x30] ss:$8 sps:$4 sm:$0xff]   ;;  %v798_v10 = vld [vmem:[#allocation5 + $0x24] ss:$8 sps:$4 sm:$0xff]  }
  0x4b   : > { %v800_v11 = vld [vmem:[#allocation5 + $0x20] ss:$8 sps:$4 sm:$0xff]   ;;  %v801_v12 = vld [vmem:[#allocation5 + $0x14] ss:$8 sps:$4 sm:$0xff]   ;;  %v803_v14 = vld [vmem:[#allocation5 + $0x10] ss:$8 sps:$4 sm:$0xff]  }
  0x4c   : > { %v833_v13 = vld [vmem:[%s1121_s23 + $0x4] ss:$8 sps:$4 sm:$0xff]   ;;  %v806_v16 = vld [vmem:[#allocation5] ss:$8 sps:$4 sm:$0xff]   ;;  %v809_v18 = vld [vmem:[#allocation5 + $0xf0] ss:$8 sps:$4 sm:$0xff]  }
  0x4d   : > { %480 = vmatpush1.bf16.msra.mxu0 %v788_v3  ;;  %v804_v15 = vld [vmem:[#allocation5 + $0x4] ss:$8 sps:$4 sm:$0xff]   ;;  %509 = vmatprep.mubr.bf16.mxu0 %v833_v13  ;;  %v807_v17 = vld [vmem:[#allocation5 + $0xf4] ss:$8 sps:$4 sm:$0xff]   ;;  %v812_v20 = vld [vmem:[#allocation5 + $0xe0] ss:$8 sps:$4 sm:$0xff]  }
  0x4e   : > { %481 = vmatprep.subr.bf16.mxu0 %v789_v4  ;;  %v810_v19 = vld [vmem:[#allocation5 + $0xe4] ss:$8 sps:$4 sm:$0xff]   ;;  %v813_v21 = vld [vmem:[#allocation5 + $0xd4] ss:$8 sps:$4 sm:$0xff]   ;;  %v815_v22 = vld [vmem:[#allocation5 + $0xd0] ss:$8 sps:$4 sm:$0xff]  }
  0x4f   : > { %v816_v23 = vld [vmem:[#allocation5 + $0xc4] ss:$8 sps:$4 sm:$0xff]   ;;  %v818_v24 = vld [vmem:[#allocation5 + $0xc0] ss:$8 sps:$4 sm:$0xff]   ;;  %v819_v25 = vld [vmem:[#allocation5 + $0xb4] ss:$8 sps:$4 sm:$0xff]  }
  0x50   : > { %v821_v26 = vld [vmem:[#allocation5 + $0xb0] ss:$8 sps:$4 sm:$0xff]   ;;  %v822_v27 = vld [vmem:[#allocation5 + $0xa4] ss:$8 sps:$4 sm:$0xff]   ;;  %v824_v28 = vld [vmem:[#allocation5 + $0xa0] ss:$8 sps:$4 sm:$0xff]  }
  0x51   : > { %482 = vmatpush1.bf16.msra.mxu0 %v791_v5  ;;  %v825_v29 = vld [vmem:[#allocation5 + $0x94] ss:$8 sps:$4 sm:$0xff]   ;;  %v827_v30 = vld [vmem:[#allocation5 + $0x90] ss:$8 sps:$4 sm:$0xff]   ;;  %v828_v31 = vld [vmem:[#allocation5 + $0x84] ss:$8 sps:$4 sm:$0xff]  }
  0x52   : > { %483 = vmatprep.subr.bf16.mxu0 %v792_v6  ;;  %v830_v32 = vld [vmem:[#allocation5 + $0x80] ss:$8 sps:$4 sm:$0xff]   ;;  %v298_v35 = vshrl.u32 %v297_v34, 7  ;;  %s677_s8 = sshll.u32 %s1117_s16, 5  ;;  %s721_s15 = sshll.u32 %s1016_s22, 9 }
  0x53   : > { %v831_v33 = vld [vmem:[%s1121_s23] ss:$8 sps:$4 sm:$0xff]   ;;  %s258_s27 = scalar_lea.vmem [#allocation7], %s677_s8  ;;  %s1147_s9 = scalar_lea.hbm %s1197_s5, %s721_s15 }
  0x54   : > { %v299_v36 = vsub.s32 0, %v298_v35  ;;  %v295_v37 = vld [vmem:[%s1194_s2] sm:$0x3]  ;;  %v303_v38 = vsub.s32 1, %v298_v35  ;;  %s583_s28 = sshll.u32 %s258_s27, 4  ;;  %s569_s17 = scalar_lea.sflag [#allocation4], %s1117_s16  ;;  %s1149_s28 = int_to_ptr.vmem [resolvable:$true] %s583_s28 }
  0x55   : > { %484 = vmatpush1.bf16.msra.mxu0 %v794_v7  ;;  %v532_v40 = vld [vmem:[%s1195_s3] sm:$0x3]  ;;  %s888_s22 = scalar_lea.vmem %s1149_s28, 512  ;;  %p1215_p11 = scmp.ne.s32.totalorder %s1208_s14, 0 }
  0x56   : > { %485 = vmatprep.subr.bf16.mxu0 %v795_v8  ;;  %v300_v39 = vrot.slane %v295_v37, %v299_v36  ;;  %v304_v41 = vrot.slane %v295_v37, %v303_v38  ;;  %v548_v44 = vld [vmem:[%s1196_s4] sm:$0x3]  ;;  %v537_v45 = vrot.slane %v532_v40, %v299_v36  ;;  %v541_v50 = vrot.slane %v532_v40, %v303_v38  ;;  %p889_p3 = scmp.ne.s32.totalorder %s1149_s28, %s888_s22  ;;  %s962_s23 = smov [#allocation7]  }
  0x57   : > { %v553_v49 = vrot.slane %v548_v44, %v299_v36  ;;  %v557_v56 = vrot.slane %v548_v44, %v303_v38  ;;  %s892_s24 = sshll.u32 %s962_s23, 4  ;;  %s893_s24 = int_to_ptr.vmem [resolvable:$false] %s892_s24 }
  0x58   : > { %p890_p7 = pnand %p889_p3, %p1215_p11  ;;  %s894_s26 = scalar_lea.vmem %s893_s24, 1024 }
  0x59   : > { %486 = vmatpush1.bf16.msra.mxu0 %v797_v9  ;;  %p895_p10 = scmp.lt.s32.totalorder %s1149_s28, %s893_s24  ;;  %p896_p12 = scmp.lt.s32.totalorder %s894_s26, %s888_s22 }
  0x5a   : > { %487 = vmatprep.subr.bf16.mxu0 %v798_v10  ;;  %p891_p9 = pneg %p890_p7 }
  0x5b   : > { %p897_p13 = por %p896_p12, %p895_p10 }
  0x5d   : > { %488 = vmatpush1.bf16.msra.mxu0 %v800_v11  ;;  %p898_p0 = pnand %p897_p13, %p891_p9 }
  0x5e   : > { %489 = vmatprep.subr.bf16.mxu0 %v801_v12 }
  0x61   : > { %490 = vmatpush1.bf16.msra.mxu0 %v803_v14 }
  0x62   : > { %491 = vmatprep.subr.bf16.mxu0 %v804_v15 }
  0x65   : > { %492 = vmatpush1.bf16.msra.mxu0 %v806_v16 }
  0x66   : > { %493 = vmatprep.subr.bf16.mxu0 %v807_v17 }
  0x69   : > { %494 = vmatpush2.bf16.msra.mxu0 %v809_v18 }
  0x6a   : > { %495 = vmatprep.subr.bf16.mxu0 %v810_v19 }
  0x6d   : > { %496 = vmatpush2.bf16.msra.mxu0 %v812_v20 }
  0x6e   : > { %497 = vmatprep.subr.bf16.mxu0 %v813_v21 }
  0x71   : > { %498 = vmatpush2.bf16.msra.mxu0 %v815_v22 }
  0x72   : > { %499 = vmatprep.subr.bf16.mxu0 %v816_v23 }
  0x75   : > { %500 = vmatpush2.bf16.msra.mxu0 %v818_v24 }
  0x76   : > { %501 = vmatprep.subr.bf16.mxu0 %v819_v25 }
  0x79   : > { %502 = vmatpush2.bf16.msra.mxu0 %v821_v26 }
  0x7a   : > { %503 = vmatprep.subr.bf16.mxu0 %v822_v27 }
  0x7d   : > { %504 = vmatpush2.bf16.msra.mxu0 %v824_v28 }
  0x7e   : > { %505 = vmatprep.subr.bf16.mxu0 %v825_v29 }
  0x81   : > { %506 = vmatpush2.bf16.msra.mxu0 %v827_v30 }
  0x82   : > { %507 = vmatprep.subr.bf16.mxu0 %v828_v31 }
  0x85   : > { %508 = vmatpush2.bf16.msra.mxu0 %v830_v32 }
  0x88   : > { %510 = vmatmul.mubr.bf16.vlgmr.msra.gmra.mxu0 %v831_v33 }
 0x148   : > { %v511_v42 = vpop.f32.mrf.mxu0 }
 0x149   : > { %v512_v43 = vadd.f32 %v511_v42, %v300_v39 }
 0x14a   : > { %v513_v46 = vpop.f32.mrf.mxu0 }
 0x14b   : > { %vm520_vm0 = vcmp.ge.f32.partialorder %v512_v43, 0.0  ;;  %v524_v47 = vmul.f32 0.01, %v512_v43  ;;  %v514_v48 = vadd.f32 %v513_v46, %v304_v41 }
 0x14c   : > { %v515_v51 = vpop.f32.mrf.mxu0 }
 0x14d   : > { %v528_v52 = vsel %vm520_vm0, %v512_v43, %v524_v47  ;;  %vm521_vm1 = vcmp.ge.f32.partialorder %v514_v48, 0.0  ;;  %v525_v53 = vmul.f32 0.01, %v514_v48  ;;  %v516_v54 = vadd.f32 %v515_v51, %v300_v39 }
 0x14e   : > { %v544_v55 = vmul.f32 %v537_v45, %v528_v52  ;;  %v517_v57 = vpop.f32.mrf.mxu0 }
 0x14f   : > { %v529_v58 = vsel %vm521_vm1, %v514_v48, %v525_v53  ;;  %vm522_vm2 = vcmp.ge.f32.partialorder %v516_v54, 0.0  ;;  %v526_v59 = vmul.f32 0.01, %v516_v54  ;;  %v518_v60 = vadd.f32 %v517_v57, %v304_v41 }
 0x150   : > { %v560_v61 = vadd.f32 %v553_v49, %v544_v55  ;;  %v545_v62 = vmul.f32 %v541_v50, %v529_v58 }
 0x151   : > { %v530_v63 = vsel %vm522_vm2, %v516_v54, %v526_v59  ;;  %vm523_vm3 = vcmp.ge.f32.partialorder %v518_v60, 0.0  ;;  %v527_v0 = vmul.f32 0.01, %v518_v60 }
 0x152   : > { %564 = vst [vmem:[%s258_s27] sm:$0xff] %v560_v61  ;;  %v561_v1 = vadd.f32 %v557_v56, %v545_v62  ;;  %v546_v2 = vmul.f32 %v537_v45, %v530_v63 }
 0x153   : > { %v531_v3 = vsel %vm523_vm3, %v518_v60, %v527_v0 }
 0x154   : > { %565 = vst [vmem:[%s258_s27 + $0x8] sm:$0xff] %v561_v1  ;;  %v562_v4 = vadd.f32 %v553_v49, %v546_v2  ;;  %v547_v5 = vmul.f32 %v541_v50, %v531_v3 }
 0x156   : > { %566 = vst [vmem:[%s258_s27 + $0x10] sm:$0xff] %v562_v4  ;;  %v563_v6 = vadd.f32 %v557_v56, %v547_v5 }
 0x158   : > { %567 = vst [vmem:[%s258_s27 + $0x18] sm:$0xff] %v563_v6 }
 0x159   : > { %901 = shalt.err (!%p898_p0)
}
 0x15a   : > { %s902_s10 = scalar_lea.hbm %s1147_s9, 512  ;;  %s906_s7 = scalar_lea.hbm %s1197_s5, 1024 }
 0x15b   : > { %p903_p5 = scmp.ne.s32.totalorder %s1147_s9, %s902_s10  ;;  %p907_p4 = scmp.lt.s32.totalorder %s1147_s9, %s1197_s5 }
 0x15c   : > { %p908_p6 = scmp.lt.s32.totalorder %s906_s7, %s902_s10 }
 0x15d   : > { %p904_p2 = pnand %p903_p5, %p1215_p11 }
 0x15e   : > { %p909_p8 = por %p908_p6, %p907_p4 }
 0x15f   : > { %p905_p1 = pneg %p904_p2 }
 0x161   : > { %p910_p3 = pnand %p909_p8, %p905_p1 }
 0x163   : > { %913 = shalt.err (!%p910_p3)
}
 0x164   : > { %s963_s15 = smov 256   ;;  %s964_s12 = smov 16  }
 0x165   : > { %728 = dma.vmem_to_hbm [thread:$0]  (%p1215_p11), %s1149_s28, 512, %s1147_s9, %s569_s17, %s963_s15, %s963_s15, %s964_s12  }
 0x166 PF: > { %s598_s11 = sand.u32 1, %s944_s18   ;;  %p1216_p7 = scmp.ne.s32.totalorder %s1204_s25, 0 }
 0x167   : > { %p1217_p9 = scmp.ge.s32.totalorder %s956_s21, 2  ;;  %s599_s22 = scalar_lea.sflag [#allocation4], %s598_s11 }
 0x169   : > { %p739_p10 = pnand %p1217_p9, %p1216_p7 }
 0x16b   : > { %p740_p12 = pneg %p739_p10 }
 0x16d   : > { %939 = dma.done.wait (%p740_p12), %s599_s22, 512  }
 0x16e   : > { %941 = vsyncadd (%p740_p12), %s599_s22, 4294966784  ;;  %p19_p13 = scmp.ge.s32.totalorder %s1049_s30, 4   ;;  %s1218_s18 = smov %s948_s19 }
 0x16f   : > { %s1219_s19 = smov %s952_s20  ;;  %s1220_s20 = smov %s1069_s13 }
 0x170   : > { %s1221_s21 = smov %s1049_s30  ;;  %21 = sbr.rel (!%p19_p13) target bundleno = 6 (0x6), region = 89 }
 0x175   :  { %604 = vsyncpa [#allocation3], 1 }
 0x176   :  { %606 = vsyncpa [#allocation3 + $0x1], 1 }
 0x177   :  { %607 = vsyncpa [#allocation6], 1 }
 0x178   :  { %608 = vsyncpa [#allocation4], 1 }
 0x179   :  { %610 = vsyncpa [#allocation4 + $0x1], 1 }

</bundles_post_ra>
